<compile_context>
chip_gen: v7x
topology: tpu7x:2x2x1
jax: 0.10.0
libtpu: 0.0.40
codegen_flags: <defaults>
</compile_context>

<pallas_src>
import functools
import math

import jax
import jax.numpy as jnp
from jax.experimental import pallas as pl
from jax.experimental.pallas import tpu as pltpu


def _round_up(a: int, b: int) -> int:
    return (a + b - 1) // b * b


def _sublane(dtype) -> int:
    # sublane packing: f32 -> 8, bf16/f16 -> 16, int8/fp8 -> 32
    return {4: 8, 2: 16, 1: 32}.get(jnp.dtype(dtype).itemsize, 8)


def _tpu_budgets(itemsize: int):
    """(vmem_limit_bytes, target_block_bytes) tuned per TPU generation."""
    vmem_cap = None
    try:
        info = pltpu.get_tpu_info()
        vmem_cap = getattr(info, "vmem_capacity_bytes", None)
    except Exception:
        vmem_cap = None
    if not vmem_cap:
        vmem_cap = 64 * 1024 * 1024          # conservative default (v7x: 64 MiB/TC)
    vmem_limit = int(vmem_cap) * 3 // 4      # 48 MiB on v7x, 96 MiB on v5e/v6e
    # Per-block budget: input + output double-buffered (4x the block) plus the
    # kernel's f32 intermediates (relatively larger for sub-32-bit dtypes).
    divisor = {4: 12, 2: 16, 1: 24}.get(itemsize, 12)
    target = max(1 << 20, min(8 << 20, vmem_limit // divisor))
    return int(vmem_limit), int(target)


def _pick_tile_rows(n_rows: int, row_bytes: int, sublane: int, target_bytes: int) -> int:
    tile = max(sublane, (target_bytes // max(row_bytes, 1)) // sublane * sublane)
    # Keep >= 4 grid steps when there is enough data so ("parallel",) can shard
    # rows across the two v7x TensorCores and the pipeline has work to overlap.
    if n_rows * row_bytes > (4 << 20):
        quarter = _round_up(-(-n_rows // 4), sublane)
        tile = min(tile, max(quarter, sublane))
    if tile >= n_rows:
        tile = n_rows            # one full-extent block (block dim == array dim)
    return max(int(tile), 1)


def _l2norm_rowwise_kernel(x_ref, o_ref, *, eps: float):
    """One normalization row per block row (D >= 128, or ragged fallback)."""
    xf = x_ref[...].astype(jnp.float32)                        # (tile, D)
    sq_sum = jnp.sum(xf * xf, axis=-1, keepdims=True)          # (tile, 1)
    # PyTorch semantics: denom = norm.clamp_min(eps); divide only the reduced
    # column, multiply the full tile on the VPU.
    inv = 1.0 / jnp.maximum(jnp.sqrt(sq_sum), eps)             # (tile, 1)
    o_ref[...] = (xf * inv).astype(o_ref.dtype)


def _l2norm_packed_kernel(s_ref, st_ref, x_ref, o_ref, *, eps: float):
    """g normalization rows packed per lane-dense block row (D < 128).

    s_ref  : (G, g) 0/1 segment-indicator matrix (G = g*D)
    st_ref : (g, G) its transpose
    """
    xf = x_ref[...].astype(jnp.float32)                        # (tile, G)
    seg_sums = jnp.dot(xf * xf, s_ref[...],
                       preferred_element_type=jnp.float32,
                       precision=jax.lax.Precision.HIGHEST)    # (tile, g) on MXU
    inv = 1.0 / jnp.maximum(jnp.sqrt(seg_sums), eps)           # (tile, g) — tiny
    scale = jnp.dot(inv, st_ref[...],
                    preferred_element_type=jnp.float32,
                    precision=jax.lax.Precision.HIGHEST)       # (tile, G) broadcast
    o_ref[...] = (xf * scale).astype(o_ref.dtype)


def l2_normalize(x: jax.Array, *, eps: float = 1e-12) -> jax.Array:
    """Equivalent of torch.nn.functional.normalize(x, p=2, dim=-1, eps=eps)."""
    orig_shape = x.shape
    d = int(orig_shape[-1])
    rows = int(math.prod(orig_shape[:-1])) if len(orig_shape) > 1 else 1
    x2 = x.reshape(rows, d)

    itemsize = jnp.dtype(x.dtype).itemsize
    sub = _sublane(x.dtype)
    vmem_limit, target_block = _tpu_budgets(itemsize)

    # Pack g consecutive rows into one lane-dense row when D is small so that
    # loads/stores are full 128-lane vectors instead of masked vst.msk.  Only
    # done when the packed reshape is free (rows % g == 0).
    g = 1
    if d < 128:
        g_cand = 128 // math.gcd(d, 128)      # smallest g with (g*d) % 128 == 0
        if g_cand * d * itemsize <= 8192 and rows % g_cand == 0:
            g = g_cand
    G = g * d
    n_prow = rows // g
    xp = x2.reshape(n_prow, G)                # contiguous reshape -> no HBM pass

    tile = _pick_tile_rows(n_prow, G * itemsize, sub, target_block)
    grid = (pl.cdiv(n_prow, tile),)           # partial last block masked by Pallas

    compiler_params = pltpu.CompilerParams(
        dimension_semantics=("parallel",),
        vmem_limit_bytes=vmem_limit,
    )
    cost = pl.CostEstimate(
        flops=3 * rows * d + (4 * rows * d * g if g > 1 else 0),
        transcendentals=2 * rows,
        bytes_accessed=2 * rows * d * itemsize,
    )

    if g == 1:
        out = pl.pallas_call(
            functools.partial(_l2norm_rowwise_kernel, eps=float(eps)),
            out_shape=jax.ShapeDtypeStruct((n_prow, G), x.dtype),
            grid=grid,
            in_specs=[pl.BlockSpec((tile, G), lambda i: (i, 0))],
            out_specs=pl.BlockSpec((tile, G), lambda i: (i, 0)),
            compiler_params=compiler_params,
            cost_estimate=cost,
        )(xp)
    else:
        # 0/1 segment-indicator matrices (tiny; built once, DMA'd once per call).
        col_seg = jnp.arange(G, dtype=jnp.int32) // d                  # (G,)
        seg_ids = jnp.arange(g, dtype=jnp.int32)                       # (g,)
        S = (col_seg[:, None] == seg_ids[None, :]).astype(jnp.float32)  # (G, g)
        S_T = jnp.transpose(S)                                          # (g, G)
        out = pl.pallas_call(
            functools.partial(_l2norm_packed_kernel, eps=float(eps)),
            out_shape=jax.ShapeDtypeStruct((n_prow, G), x.dtype),
            grid=grid,
            in_specs=[
                pl.BlockSpec((G, g), lambda i: (0, 0)),
                pl.BlockSpec((g, G), lambda i: (0, 0)),
                pl.BlockSpec((tile, G), lambda i: (i, 0)),
            ],
            out_specs=pl.BlockSpec((tile, G), lambda i: (i, 0)),
            compiler_params=compiler_params,
            cost_estimate=cost,
        )(S, S_T, xp)

    return out.reshape(orig_shape)            # contiguous reshape -> free


class L2Norm:
    """Thin functional mirror of the PyTorch module (p=2, dim=-1 only)."""

    def __init__(self, p: int = 2, dim: int = -1, eps: float = 1e-12):
        assert p == 2 and dim == -1, "only p=2, dim=-1 (module defaults) supported"
        self.eps = eps

    def __call__(self, x):
        return l2_normalize(x, eps=self.eps)


if __name__ == "__main__":
    key = jax.random.PRNGKey(0)
    k1, k2, k3 = jax.random.split(key, 3)

    l2n = jax.jit(functools.partial(l2_normalize, eps=1e-12))

    def ref_fn(x, eps=1e-12):
        xf = x.astype(jnp.float32)
        norm = jnp.sqrt(jnp.sum(xf * xf, axis=-1, keepdims=True))
        return (xf / jnp.maximum(norm, eps)).astype(x.dtype)

    # Primary case: batch=2, seq=8, hidden=32 -> lane-dense packed path (g=4, G=128).
    x1 = jax.random.normal(k1, (2, 8, 32), dtype=jnp.float32)
    y1 = jax.block_until_ready(l2n(x1))
    assert y1.shape == x1.shape and y1.dtype == x1.dtype
    assert jnp.allclose(y1, ref_fn(x1), atol=1e-5, rtol=1e-5), \
        float(jnp.max(jnp.abs(y1 - ref_fn(x1))))

    # Hidden >= 128 -> plain row-wise path: batch=2, seq=4, hidden=256.
    x2 = jax.random.normal(k2, (2, 4, 256), dtype=jnp.float32)
    y2 = jax.block_until_ready(l2n(x2))
    assert jnp.allclose(y2, ref_fn(x2), atol=1e-5, rtol=1e-5), \
        float(jnp.max(jnp.abs(y2 - ref_fn(x2))))

    # Ragged row count with small hidden (rows % g != 0) -> row-wise fallback,
    # still zero extra HBM passes.
    x3 = jax.random.normal(k3, (3, 5, 32), dtype=jnp.float32)
    y3 = jax.block_until_ready(l2n(x3))
    assert jnp.allclose(y3, ref_fn(x3), atol=1e-5, rtol=1e-5), \
        float(jnp.max(jnp.abs(y3 - ref_fn(x3))))

    print("KERNEL_OK")
</pallas_src>

<mosaic_0001>
module attributes {stable_mosaic.version = 11 : i64} {
  func.func @_l2norm_packed_kernel(%arg0: i32, %arg1: memref<128x4xf32, #tpu.memory_space<vmem>>, %arg2: memref<4x128xf32, #tpu.memory_space<vmem>>, %arg3: memref<4x128xf32, #tpu.memory_space<vmem>>, %arg4: memref<4x128xf32, #tpu.memory_space<vmem>>) attributes {dimension_semantics = [#tpu.dimension_semantics<parallel>], iteration_bounds = array<i64: 1>, scalar_prefetch = 0 : i64, scratch_operands = 0 : i64, tpu.core_type = #tpu.core_type<tc>, window_params = [{pipeline_mode = #tpu.pipeline_mode<synchronous>, transform_indices = @transform_0, window_bounds = array<i64: 128, 4>}, {pipeline_mode = #tpu.pipeline_mode<synchronous>, transform_indices = @transform_1, window_bounds = array<i64: 4, 128>}, {transform_indices = @transform_2, window_bounds = array<i64: 4, 128>}, {transform_indices = @transform_3, window_bounds = array<i64: 4, 128>}]} {
    %c0 = arith.constant 0 : index
    %c0_0 = arith.constant 0 : index
    %0 = vector.load %arg3[%c0, %c0_0] : memref<4x128xf32, #tpu.memory_space<vmem>>, vector<4x128xf32>
    %1 = arith.mulf %0, %0 : vector<4x128xf32>
    %c0_1 = arith.constant 0 : index
    %c0_2 = arith.constant 0 : index
    %2 = vector.load %arg1[%c0_1, %c0_2] : memref<128x4xf32, #tpu.memory_space<vmem>>, vector<128x4xf32>
    %cst = arith.constant dense<0.000000e+00> : vector<4x4xf32>
    %3 = tpu.matmul %1, %2, %cst {dimension_numbers = #tpu.dot_dimension_numbers<[1], [0], [0], [1], [0, 0, 1, 1], [], []>, precision = #tpu.contract_precision<fp32>} : vector<4x128xf32>, vector<128x4xf32>, vector<4x4xf32> -> vector<4x4xf32>
    %4 = math.sqrt %3 : vector<4x4xf32>
    %cst_3 = arith.constant 9.99999996E-13 : f32
    %5 = vector.broadcast %cst_3 : f32 to vector<4x4xf32>
    %6 = arith.maximumf %4, %5 : vector<4x4xf32>
    %cst_4 = arith.constant 1.000000e+00 : f32
    %7 = vector.broadcast %cst_4 : f32 to vector<4x4xf32>
    %8 = arith.divf %7, %6 : vector<4x4xf32>
    %c0_5 = arith.constant 0 : index
    %c0_6 = arith.constant 0 : index
    %9 = vector.load %arg2[%c0_5, %c0_6] : memref<4x128xf32, #tpu.memory_space<vmem>>, vector<4x128xf32>
    %cst_7 = arith.constant dense<0.000000e+00> : vector<4x128xf32>
    %10 = tpu.matmul %8, %9, %cst_7 {dimension_numbers = #tpu.dot_dimension_numbers<[1], [0], [0], [1], [0, 0, 1, 1], [], []>, precision = #tpu.contract_precision<fp32>} : vector<4x4xf32>, vector<4x128xf32>, vector<4x128xf32> -> vector<4x128xf32>
    %11 = arith.mulf %0, %10 : vector<4x128xf32>
    %c0_8 = arith.constant 0 : index
    %c0_9 = arith.constant 0 : index
    %12 = vector.load %arg4[%c0_8, %c0_9] : memref<4x128xf32, #tpu.memory_space<vmem>>, vector<4x128xf32>
    tpu.vector_store %arg4[%c0_8, %c0_9], %11 {strides = array<i32>} : memref<4x128xf32, #tpu.memory_space<vmem>>, vector<4x128xf32>,
    return
  }
  func.func @transform_0(%arg0: i32) -> (i32, i32) {
    %c0_i32 = arith.constant 0 : i32
    %c0_i32_0 = arith.constant 0 : i32
    %c0_i32_1 = arith.constant 0 : i32
    return %c0_i32, %c0_i32_0 : i32, i32
  }
  func.func @transform_1(%arg0: i32) -> (i32, i32) {
    %c0_i32 = arith.constant 0 : i32
    %c0_i32_0 = arith.constant 0 : i32
    %c0_i32_1 = arith.constant 0 : i32
    return %c0_i32, %c0_i32_0 : i32, i32
  }
  func.func @transform_2(%arg0: i32) -> (i32, i32) {
    %c0_i32 = arith.constant 0 : i32
    %c0_i32_0 = arith.constant 0 : i32
    return %arg0, %c0_i32 : i32, i32
  }
  func.func @transform_3(%arg0: i32) -> (i32, i32) {
    %c0_i32 = arith.constant 0 : i32
    %c0_i32_0 = arith.constant 0 : i32
    return %arg0, %c0_i32 : i32, i32
  }
}

</mosaic_0001>

<bundles_post_ra>
// kernel: l2_normalize.1
= control target key start
LH: loop header
LB: loop body
LE: loop exit
PB: predicated region body
PF: predicated region fallthrough
CT: control target
= control target key end

     0   :  { %v1667_v0 = vmov 0.0|0.0   ;;  %vm1668_vm0 = vmmov 0   ;;  %v1669_v8 = vmov 0.0   ;;  %vm688_vm1 = vcmask 1043456   ;;  %s2025_s0 = inlined_call_operand.vmem [shape: f32[128,4], index: 0, kind: input, shape index: {}]   ;;  %s2026_s2 = inlined_call_operand.vmem [shape: f32[4,128], index: 2, kind: input, shape index: {}]   ;;  %s2027_s1 = inlined_call_operand.vmem [shape: f32[4,128], index: 1, kind: input, shape index: {}]   ;;  %s2028_s3 = inlined_call_operand.vmem [shape: f32[4,128], index: 3, kind: output, shape index: {}]  }
   0x1   :  { %1498 = vmatprep.subr.bf16.mxu1 %v1667_v0  ;;  %1570 = vmatprep.subr.bf16.mxu0 %v1667_v0  ;;  %v16_v1 = vld [vmem:[%s2025_s0] sm:$0xff]  ;;  %v17_v2 = vld [vmem:[%s2025_s0 + $0x8] sm:$0xff]  ;;  %v18_v3 = vld [vmem:[%s2025_s0 + $0x10] sm:$0xff]  ;;  %vm684_vm4 = vcmask 31744  }
   0x2   :  { %v33_v4 = vand.u32 4294901760, %v16_v1  ;;  %v36_v5 = vand.u32 4294901760, %v17_v2  ;;  %v19_v6 = vld [vmem:[%s2025_s0 + $0x18] sm:$0xff]  ;;  %v39_v7 = vand.u32 4294901760, %v18_v3  ;;  %1290 = vmatprep.mubr.msk.f32.mxu1 %vm1668_vm0, %v1669_v8  ;;  %1395 = vmatprep.mubr.msk.f32.mxu0 %vm1668_vm0, %v1669_v8  ;;  %v20_v10 = vld [vmem:[%s2025_s0 + $0x20] sm:$0xff]  ;;  %v21_v11 = vld [vmem:[%s2025_s0 + $0x28] sm:$0xff] }
   0x3   :  { %v42_v9 = vand.u32 4294901760, %v19_v6  ;;  %v45_v14 = vand.u32 4294901760, %v20_v10  ;;  %v48_v15 = vand.u32 4294901760, %v21_v11  ;;  %v1725_v16 = vld [vmem:[%s2025_s0 + $0x30] sm:$0xff]  ;;  %v1730_v17 = vld [vmem:[%s2025_s0 + $0x38] sm:$0xff]  ;;  %v1748_v22 = vld [vmem:[%s2025_s0 + $0x40] sm:$0xff] }
   0x4   :  { %v1714_v12 = vpack.c.bf16 %v36_v5, %v33_v4  ;;  %v51_v19 = vand.u32 4294901760, %v1725_v16  ;;  %v54_v20 = vand.u32 4294901760, %v1730_v17  ;;  %v1741_v21 = vld [vmem:[%s2026_s2] sm:$0xf]  ;;  %v1753_v23 = vld [vmem:[%s2025_s0 + $0x48] sm:$0xff]  ;;  %v57_v26 = vand.u32 4294901760, %v1748_v22 }
   0x5   :  { %v1718_v13 = vpack.c.bf16 %v42_v9, %v39_v7  ;;  %v1734_v18 = vpack.c.bf16 %v48_v15, %v45_v14  ;;  %v15_v24 = vmul.f32 %v1741_v21, %v1741_v21  ;;  %v60_v27 = vand.u32 4294901760, %v1753_v23  ;;  %v1768_v28 = vld [vmem:[%s2025_s0 + $0x50] sm:$0xff]  ;;  %v1773_v29 = vld [vmem:[%s2025_s0 + $0x58] sm:$0xff]  ;;  %v1790_v36 = vld [vmem:[%s2025_s0 + $0x60] sm:$0xff] }
   0x6   :  { %1500 = vmatpush3.bf16.msra.mxu1 %v1714_v12  ;;  %1572 = vmatpush3.bf16.msra.mxu0 %v1714_v12  ;;  %v1759_v25 = vpack.c.bf16 %v54_v20, %v51_v19  ;;  %v1775_v30 = vsub.f32 %v16_v1, %v33_v4  ;;  %v1779_v32 = vsub.f32 %v17_v2, %v36_v5  ;;  %v63_v34 = vand.u32 4294901760, %v1768_v28  ;;  %v1797_v37 = vld [vmem:[%s2025_s0 + $0x68] sm:$0xff]  ;;  %v1819_v44 = vld [vmem:[%s2025_s0 + $0x70] sm:$0xff]  ;;  %v1824_v45 = vld [vmem:[%s2025_s0 + $0x78] sm:$0xff] }
   0x7   :  { %1501 = vmatprep.subr.bf16.mxu1 %v1667_v0  ;;  %1573 = vmatprep.subr.bf16.mxu0 %v1667_v0  ;;  %v1777_v31 = vand.u32 4294901760, %v15_v24  ;;  %v1783_v33 = vpack.c.bf16 %v60_v27, %v57_v26  ;;  %v66_v35 = vand.u32 4294901760, %v1773_v29  ;;  %v1799_v38 = vsub.f32 %v18_v3, %v39_v7 }
   0x8   :  { %v1801_v39 = vsub.f32 %v19_v6, %v42_v9  ;;  %v69_v40 = vand.u32 4294901760, %v1790_v36  ;;  %v72_v43 = vand.u32 4294901760, %v1797_v37  ;;  %v126_v46 = vand.u32 4294901760, %v1775_v30 }
   0x9   :  { %v1805_v41 = vsub.f32 %v15_v24, %v1777_v31  ;;  %v1813_v42 = vpack.c.bf16 %v66_v35, %v63_v34  ;;  %v133_v47 = vand.u32 4294901760, %v1779_v32  ;;  %v1830_v48 = vsub.f32 %v20_v10, %v45_v14 }
   0xa   :  { %1503 = vmatpush3.bf16.msra.mxu1 %v1718_v13  ;;  %1575 = vmatpush3.bf16.msra.mxu0 %v1718_v13  ;;  %v1832_v49 = vsub.f32 %v21_v11, %v48_v15  ;;  %v75_v50 = vand.u32 4294901760, %v1819_v44  ;;  %v78_v51 = vand.u32 4294901760, %v1824_v45  ;;  %v140_v53 = vand.u32 4294901760, %v1799_v38 }
   0xb   :  { %1504 = vmatprep.subr.bf16.mxu1 %v1667_v0  ;;  %1576 = vmatprep.subr.bf16.mxu0 %v1667_v0  ;;  %v115_v52 = vand.u32 4294901760, %v1805_v41  ;;  %v1844_v54 = vpack.c.bf16 %v72_v43, %v69_v40  ;;  %v127_v55 = vsub.f32 %v1775_v30, %v126_v46  ;;  %v134_v56 = vsub.f32 %v1779_v32, %v133_v47 }
   0xc   :  { %v147_v57 = vand.u32 4294901760, %v1801_v39  ;;  %v1852_v58 = vsub.f32 %v1725_v16, %v51_v19  ;;  %v1855_v59 = vsub.f32 %v1730_v17, %v54_v20  ;;  %v141_v61 = vsub.f32 %v1799_v38, %v140_v53 }
   0xd   :  { %v116_v60 = vsub.f32 %v1805_v41, %v115_v52  ;;  %v154_v62 = vand.u32 4294901760, %v1830_v48  ;;  %v161_v63 = vand.u32 4294901760, %v1832_v49  ;;  %v1867_v1 = vpack.c.bf16 %v78_v51, %v75_v50 }
   0xe   :  { %1506 = vmatpush3.bf16.msra.mxu1 %v1734_v18  ;;  %1578 = vmatpush3.bf16.msra.mxu0 %v1734_v18  ;;  %v128_v2 = vand.u32 4294901760, %v127_v55  ;;  %v135_v3 = vand.u32 4294901760, %v134_v56  ;;  %v148_v4 = vsub.f32 %v1801_v39, %v147_v57  ;;  %v1873_v5 = vsub.f32 %v1748_v22, %v57_v26 }
   0xf   :  { %1507 = vmatprep.subr.bf16.mxu1 %v1667_v0  ;;  %1579 = vmatprep.subr.bf16.mxu0 %v1667_v0  ;;  %v1876_v6 = vsub.f32 %v1753_v23, %v60_v27  ;;  %v1595_v7 = vpack.c.bf16 %v133_v47, %v126_v46  ;;  %v117_v9 = vand.u32 4294901760, %v116_v60  ;;  %v142_v10 = vand.u32 4294901760, %v141_v61 }
  0x10   :  { %v155_v11 = vsub.f32 %v1830_v48, %v154_v62  ;;  %v162_v14 = vsub.f32 %v1832_v49, %v161_v63  ;;  %v1523_v15 = vpack.c.bf16 %v135_v3, %v128_v2  ;;  %v149_v16 = vand.u32 4294901760, %v148_v4 }
  0x11   :  { %v168_v17 = vand.u32 4294901760, %v1852_v58  ;;  %v175_v19 = vand.u32 4294901760, %v1855_v59  ;;  %v1889_v20 = vsub.f32 %v1768_v28, %v63_v34  ;;  %v1894_v22 = vsub.f32 %v1773_v29, %v66_v35 }
  0x12   :  { %1509 = vmatpush3.bf16.msra.mxu1 %v1759_v25  ;;  %1581 = vmatpush3.bf16.msra.mxu0 %v1759_v25  ;;  %v1598_v23 = vpack.c.bf16 %v147_v57, %v140_v53  ;;  %v156_v24 = vand.u32 4294901760, %v155_v11  ;;  %v163_v26 = vand.u32 4294901760, %v162_v14  ;;  %v182_v27 = vand.u32 4294901760, %v1873_v5 }
  0x13   :  { %1510 = vmatprep.subr.bf16.mxu1 %v1667_v0  ;;  %1582 = vmatprep.subr.bf16.mxu0 %v1667_v0  ;;  %v1526_v46 = vpack.c.bf16 %v149_v16, %v142_v10  ;;  %v169_v47 = vsub.f32 %v1852_v58, %v168_v17  ;;  %v176_v28 = vsub.f32 %v1855_v59, %v175_v19  ;;  %v189_v34 = vand.u32 4294901760, %v1876_v6 }
  0x14   :  { %v1905_v29 = vsub.f32 %v1790_v36, %v69_v40  ;;  %v1910_v35 = vsub.f32 %v1797_v37, %v72_v43  ;;  %v1601_v53 = vpack.c.bf16 %v161_v63, %v154_v62  ;;  %v183_v55 = vsub.f32 %v1873_v5, %v182_v27 }
  0x15   :  { %v196_v56 = vand.u32 4294901760, %v1889_v20  ;;  %v170_v36 = vand.u32 4294901760, %v169_v47  ;;  %v177_v40 = vand.u32 4294901760, %v176_v28  ;;  %v190_v57 = vsub.f32 %v1876_v6, %v189_v34 }
  0x16   :  { %1512 = vmatpush3.bf16.msra.mxu1 %v1783_v33  ;;  %1584 = vmatpush3.bf16.msra.mxu0 %v1783_v33  ;;  %v203_v37 = vand.u32 4294901760, %v1894_v22  ;;  %v1925_v43 = vsub.f32 %v1819_v44, %v75_v50  ;;  %v1930_v60 = vsub.f32 %v1824_v45, %v78_v51  ;;  %v1604_v61 = vpack.c.bf16 %v175_v19, %v168_v17 }
  0x17   :  { %1513 = vmatprep.subr.bf16.mxu1 %v1667_v0  ;;  %1585 = vmatprep.subr.bf16.mxu0 %v1667_v0  ;;  %v184_v62 = vand.u32 4294901760, %v183_v55  ;;  %v197_v63 = vsub.f32 %v1889_v20, %v196_v56  ;;  %v210_v2 = vand.u32 4294901760, %v1905_v29  ;;  %v1532_v3 = vpack.c.bf16 %v177_v40, %v170_v36 }
  0x18   :  { %v191_v4 = vand.u32 4294901760, %v190_v57  ;;  %v217_v44 = vand.u32 4294901760, %v1910_v35  ;;  %v1607_v45 = vpack.c.bf16 %v189_v34, %v182_v27  ;;  %v1610_v16 = vpack.c.bf16 %v203_v37, %v196_v56 }
  0x19   :  { %v198_v50 = vand.u32 4294901760, %v197_v63  ;;  %v211_v51 = vsub.f32 %v1905_v29, %v210_v2  ;;  %v1550_v55 = vpack.c.bf16 %v1801_v39, %v1799_v38 }
  0x1a   :  { %1515 = vmatpush3.bf16.msra.mxu1 %v1813_v42  ;;  %1587 = vmatpush3.bf16.msra.mxu0 %v1813_v42  ;;  %v1535_v10 = vpack.c.bf16 %v191_v4, %v184_v62  ;;  %v218_v14 = vsub.f32 %v1910_v35, %v217_v44 }
  0x1b   :  { %1516 = vmatprep.subr.bf16.mxu1 %v1667_v0  ;;  %1588 = vmatprep.subr.bf16.mxu0 %v1667_v0  ;;  %v212_v17 = vand.u32 4294901760, %v211_v51 }
  0x1e   :  { %1518 = vmatpush3.bf16.msra.mxu1 %v1844_v54  ;;  %1590 = vmatpush3.bf16.msra.mxu0 %v1844_v54 }
  0x1f   :  { %1519 = vmatprep.subr.bf16.mxu1 %v1667_v0  ;;  %1591 = vmatprep.subr.bf16.mxu0 %v1667_v0 }
  0x22   :  { %1521 = vmatpush3.bf16.msra.mxu1 %v1867_v1  ;;  %1593 = vmatpush3.bf16.msra.mxu0 %v1867_v1 }
  0x23   :  { %1522 = vmatprep.subr.bf16.mxu1 %v1667_v0  ;;  %1594 = vmatprep.subr.bf16.mxu0 %v1667_v0 }
  0x25   :  { %1291 = vmatmul.mubr.f32.vlgmr.msra.gmra.mrb[0].mxu1 %v117_v9  ;;  %1396 = vmatmul.mubr.f32.vlgmr.msra.gmra.mrb[0].mxu0 %v115_v52  ;;  %v1529_v52 = vpack.c.bf16 %v163_v26, %v156_v24  ;;  %v224_v9 = vand.u32 4294901760, %v1925_v43 }
  0x26   :  { %1524 = vmatpush3.bf16.msra.mxu1 %v1523_v15  ;;  %1596 = vmatpush3.bf16.msra.mxu0 %v1595_v7  ;;  %v204_v7 = vsub.f32 %v1894_v22, %v203_v37  ;;  %v231_v15 = vand.u32 4294901760, %v1930_v60 }
  0x27   :  { %1525 = vmatprep.subr.bf16.mxu1 %v1667_v0  ;;  %1597 = vmatprep.subr.bf16.mxu0 %v1667_v0  ;;  %v225_v24 = vsub.f32 %v1925_v43, %v224_v9 }
  0x28   :  { %1325 = vmatprep.mubr.msk.f32.mxu1 %vm1668_vm0, %v1669_v8  ;;  %1430 = vmatprep.mubr.msk.f32.mxu0 %vm1668_vm0, %v1669_v8  ;;  %v205_v11 = vand.u32 4294901760, %v204_v7  ;;  %v232_v26 = vsub.f32 %v1930_v60, %v231_v15 }
  0x29   :  { %v226_v47 = vand.u32 4294901760, %v225_v24 }
  0x2a   :  { %1527 = vmatpush3.bf16.msra.mxu1 %v1526_v46  ;;  %1599 = vmatpush3.bf16.msra.mxu0 %v1598_v23  ;;  %v1538_v19 = vpack.c.bf16 %v205_v11, %v198_v50  ;;  %v219_v23 = vand.u32 4294901760, %v218_v14  ;;  %v1613_v46 = vpack.c.bf16 %v217_v44, %v210_v2  ;;  %v233_v28 = vand.u32 4294901760, %v232_v26 }
  0x2b   :  { %1528 = vmatprep.subr.bf16.mxu1 %v1667_v0  ;;  %1600 = vmatprep.subr.bf16.mxu0 %v1667_v0 }
  0x2c   :  { %v1541_v27 = vpack.c.bf16 %v219_v23, %v212_v17  ;;  %v1544_v34 = vpack.c.bf16 %v233_v28, %v226_v47 }
  0x2e   :  { %1530 = vmatpush3.bf16.msra.mxu1 %v1529_v52  ;;  %1602 = vmatpush3.bf16.msra.mxu0 %v1601_v53  ;;  %v1616_v52 = vpack.c.bf16 %v231_v15, %v224_v9  ;;  %v1547_v53 = vpack.c.bf16 %v1779_v32, %v1775_v30  ;;  %v1553_v30 = vpack.c.bf16 %v1832_v49, %v1830_v48 }
  0x2f   :  { %1531 = vmatprep.subr.bf16.mxu1 %v1667_v0  ;;  %1603 = vmatprep.subr.bf16.mxu0 %v1667_v0  ;;  %v1568_v32 = vpack.c.bf16 %v1930_v60, %v1925_v43 }
  0x32   :  { %1533 = vmatpush3.bf16.msra.mxu1 %v1532_v3  ;;  %1605 = vmatpush3.bf16.msra.mxu0 %v1604_v61 }
  0x33   :  { %1534 = vmatprep.subr.bf16.mxu1 %v1667_v0  ;;  %1606 = vmatprep.subr.bf16.mxu0 %v1667_v0 }
  0x36   :  { %1536 = vmatpush3.bf16.msra.mxu1 %v1535_v10  ;;  %1608 = vmatpush3.bf16.msra.mxu0 %v1607_v45 }
  0x37   :  { %1537 = vmatprep.subr.bf16.mxu1 %v1667_v0  ;;  %1609 = vmatprep.subr.bf16.mxu0 %v1667_v0 }
  0x3a   :  { %1539 = vmatpush3.bf16.msra.mxu1 %v1538_v19  ;;  %1611 = vmatpush3.bf16.msra.mxu0 %v1610_v16 }
  0x3b   :  { %1540 = vmatprep.subr.bf16.mxu1 %v1667_v0  ;;  %1612 = vmatprep.subr.bf16.mxu0 %v1667_v0 }
  0x3e   :  { %1542 = vmatpush3.bf16.msra.mxu1 %v1541_v27  ;;  %1614 = vmatpush3.bf16.msra.mxu0 %v1613_v46 }
  0x3f   :  { %1543 = vmatprep.subr.bf16.mxu1 %v1667_v0  ;;  %1615 = vmatprep.subr.bf16.mxu0 %v1667_v0 }
  0x42   :  { %1545 = vmatpush3.bf16.msra.mxu1 %v1544_v34  ;;  %1617 = vmatpush3.bf16.msra.mxu0 %v1616_v52 }
  0x43   :  { %1546 = vmatprep.subr.bf16.mxu1 %v1667_v0  ;;  %1618 = vmatprep.subr.bf16.mxu0 %v1667_v0 }
  0x45   :  { %1326 = vmatmul.mubr.f32.vlgmr.msra.gmra.mrb[0].mxu1 %v1777_v31  ;;  %1431 = vmatmul.mubr.f32.vlgmr.msra.gmra.mrb[0].mxu0 %v1777_v31 }
  0x46   :  { %1548 = vmatpush3.bf16.msra.mxu1 %v1547_v53  ;;  %1620 = vmatpush3.bf16.msra.mxu0 %v1714_v12  ;;  %v1556_v12 = vpack.c.bf16 %v1855_v59, %v1852_v58 }
  0x47   :  { %1549 = vmatprep.subr.bf16.mxu1 %v1667_v0  ;;  %1621 = vmatprep.subr.bf16.mxu0 %v1667_v0 }
  0x48   :  { %1360 = vmatprep.mubr.msk.f32.mxu1 %vm1668_vm0, %v1669_v8  ;;  %1465 = vmatprep.mubr.msk.f32.mxu0 %vm1668_vm0, %v1669_v8 }
  0x4a   :  { %1551 = vmatpush3.bf16.msra.mxu1 %v1550_v55  ;;  %1623 = vmatpush3.bf16.msra.mxu0 %v1718_v13  ;;  %v1559_v13 = vpack.c.bf16 %v1876_v6, %v1873_v5 }
  0x4b   :  { %1552 = vmatprep.subr.bf16.mxu1 %v1667_v0  ;;  %1624 = vmatprep.subr.bf16.mxu0 %v1667_v0 }
  0x4e   :  { %1554 = vmatpush3.bf16.msra.mxu1 %v1553_v30  ;;  %1626 = vmatpush3.bf16.msra.mxu0 %v1734_v18  ;;  %v1562_v18 = vpack.c.bf16 %v1894_v22, %v1889_v20 }
  0x4f   :  { %1555 = vmatprep.subr.bf16.mxu1 %v1667_v0  ;;  %1627 = vmatprep.subr.bf16.mxu0 %v1667_v0 }
  0x52   :  { %1557 = vmatpush3.bf16.msra.mxu1 %v1556_v12  ;;  %1629 = vmatpush3.bf16.msra.mxu0 %v1759_v25  ;;  %v1565_v25 = vpack.c.bf16 %v1910_v35, %v1905_v29 }
  0x53   :  { %1558 = vmatprep.subr.bf16.mxu1 %v1667_v0  ;;  %1630 = vmatprep.subr.bf16.mxu0 %v1667_v0 }
  0x56   :  { %1560 = vmatpush3.bf16.msra.mxu1 %v1559_v13  ;;  %1632 = vmatpush3.bf16.msra.mxu0 %v1783_v33 }
  0x57   :  { %1561 = vmatprep.subr.bf16.mxu1 %v1667_v0  ;;  %1633 = vmatprep.subr.bf16.mxu0 %v1667_v0 }
  0x5a   :  { %1563 = vmatpush3.bf16.msra.mxu1 %v1562_v18  ;;  %1635 = vmatpush3.bf16.msra.mxu0 %v1813_v42 }
  0x5b   :  { %1564 = vmatprep.subr.bf16.mxu1 %v1667_v0  ;;  %1636 = vmatprep.subr.bf16.mxu0 %v1667_v0 }
  0x5e   :  { %1566 = vmatpush3.bf16.msra.mxu1 %v1565_v25  ;;  %1638 = vmatpush3.bf16.msra.mxu0 %v1844_v54 }
  0x5f   :  { %1567 = vmatprep.subr.bf16.mxu1 %v1667_v0  ;;  %1639 = vmatprep.subr.bf16.mxu0 %v1667_v0  ;;  %v683_v0 = vld [vmem:[%s2027_s1] sm:$0xf] }
  0x60   :  { %v690_v33 = vsel %vm688_vm1, %v683_v0, 0 }
  0x61   :  { %v693_v38 = vand.u32 4294901760, %v690_v33 }
  0x62   :  { %1569 = vmatpush3.bf16.msra.mxu1 %v1568_v32  ;;  %1641 = vmatpush3.bf16.msra.mxu0 %v1867_v1 }
  0x63   :  { %1483 = vmatprep.subr.mxu1 %v1669_v8  ;;  %1468 = vmatprep.subr.mxu0 %v1669_v8  ;;  %v770_v6 = vsub.f32 %v690_v33, %v693_v38 }
  0x65   :  { %1361 = vmatmul.mubr.f32.vlgmr.msra.gmra.mrb[0].mxu1 %v1805_v41  ;;  %1466 = vmatmul.mubr.f32.vlgmr.msra.gmra.mrb[0].mxu0 %v1777_v31  ;;  %v771_v29 = vand.u32 4294901760, %v770_v6 }
  0x66   :  { %1485 = vmatprep.mubr.msk.f32.mxu1 %vm1668_vm0, %v1669_v8  ;;  %1470 = vmatprep.mubr.msk.f32.mxu0 %vm1668_vm0, %v1669_v8 }
  0x67   :  { %1484 = vmatpush3.msra.mxu1 %v693_v38  ;;  %1469 = vmatpush3.msra.mxu0 %v693_v38  ;;  %v772_v36 = vsub.f32 %v770_v6, %v771_v29 }
  0x68   :  { %1473 = vmatprep.subr.mxu0 %v1669_v8  ;;  %1488 = vmatprep.subr.mxu1 %v1669_v8 }
  0x69   :  { %v773_v37 = vand.u32 4294901760, %v772_v36 }
 0x138   :  { %v374_v31 = vpop.f32.mrb[0].mxu1  ;;  %v669_v39 = vpop.f32.mrb[0].mxu0 }
 0x139   :  { %v1642_v41 = vadd.f32 %v669_v39, %v374_v31  ;;  %v1362_v42 = vpop.f32.mrb[1].mxu1  ;;  %v1467_v48 = vpop.f32.mrb[1].mxu0 }
 0x13b   :  { %1663 = vrsqrt.f32 %v1642_v41  ;;  %vm675_vm2 = vcmp.eq.f32.partialorder %v1642_v41, inf  ;;  %v678_v58 = vand.u32 2147483648, %v1642_v41  ;;  %vm677_vm3 = vcmp.eq.f32.partialorder %v1642_v41, 0.0 }
 0x145   :  { %v1664_v49 = vpop.eup %1663 }
 0x146   :  { %v674_v54 = vmul.f32 %v1664_v49, %v1642_v41 }
 0x148   :  { %v676_v59 = vsel %vm675_vm2, %v1642_v41, %v674_v54 }
 0x149   :  { %v679_v1 = vsel %vm677_vm3, %v678_v58, %v676_v59 }
 0x14a   :  { %v680_v5 = vmax.f32 %v679_v1, 1e-12 }
 0x14c   :  { %1665 = vrcp.f32 %v680_v5 }
 0x156   :  { %v1666_v20 = vpop.eup %1665 }
 0x157   :  { %v686_v22 = vsel %vm684_vm4, %v1666_v20, 0 }
 0x158   :  { %v758_v35 = vand.u32 4294901760, %v686_v22 }
 0x15a   :  { %v759_v56 = vsub.f32 %v686_v22, %v758_v35 }
 0x15c   :  { %v760_v40 = vand.u32 4294901760, %v759_v56 }
 0x15e   :  { %1486 = vmatmul.mubr.f32.vlgmr.msra.gmra.mrb[2].mxu1 %v760_v40  ;;  %v761_v57 = vsub.f32 %v759_v56, %v760_v40 }
 0x15f   :  { %1489 = vmatpush3.msra.mxu1 %v771_v29  ;;  %1490 = vmatprep.mubr.msk.f32.mxu1 %vm1668_vm0, %v1669_v8 }
 0x160   :  { %v762_v43 = vand.u32 4294901760, %v761_v57  ;;  %1493 = vmatprep.subr.mxu1 %v1669_v8 }
 0x162   :  { %1471 = vmatmul.mubr.f32.vlgmr.msra.gmra.mrb[2].mxu0 %v762_v43 }
 0x163   :  { %1474 = vmatpush3.msra.mxu0 %v773_v37  ;;  %1475 = vmatprep.mubr.msk.f32.mxu0 %vm1668_vm0, %v1669_v8 }
 0x164   :  { %1478 = vmatprep.subr.mxu0 %v1669_v8 }
 0x166   :  { %1491 = vmatmul.mubr.f32.vlgmr.msra.gmra.mrb[2].mxu1 %v758_v35 }
 0x167   :  { %1494 = vmatpush3.msra.mxu1 %v693_v38  ;;  %1495 = vmatprep.mubr.msk.f32.mxu1 %vm1668_vm0, %v1669_v8 }
 0x16a   :  { %1476 = vmatmul.mubr.f32.vlgmr.msra.gmra.mrb[2].mxu0 %v758_v35 }
 0x16b   :  { %1479 = vmatpush3.msra.mxu0 %v770_v6  ;;  %1480 = vmatprep.mubr.msk.f32.mxu0 %vm1668_vm0, %v1669_v8 }
 0x16e   :  { %1496 = vmatmul.mubr.f32.vlgmr.msra.gmra.mrb[2].mxu1 %v758_v35 }
 0x172   :  { %1481 = vmatmul.mubr.f32.vlgmr.msra.gmra.mrb[2].mxu0 %v759_v56 }
 0x241   :  { %v1134_v60 = vpop.f32.mrb[2].mxu1 }
 0x242   :  { %v1497_v61 = vpop.f32.mrb[3].mxu1 }
 0x245   :  { %v914_v62 = vpop.f32.mrb[2].mxu0 }
 0x246   :  { %v1643_v63 = vadd.f32 %v1134_v60, %v914_v62  ;;  %v1482_v2 = vpop.f32.mrb[3].mxu0 }
 0x248   :  { %v1138_v3 = vmul.f32 %v1643_v63, %v1741_v21 }
 0x24a   :  { %1139 = vst [vmem:[%s2028_s3] sm:$0xf] %v1138_v3 }

</bundles_post_ra>
